<compile_context>
chip_gen: v7x
topology: tpu7x:2x2x1
jax: 0.10.0
libtpu: 0.0.40
codegen_flags: <defaults>
</compile_context>

<pallas_src>
import functools

import jax
import jax.numpy as jnp
from jax import lax
from jax.experimental import pallas as pl
from jax.experimental.pallas import tpu as pltpu

G = 6.6743e-11
M_EARTH = 5.972e24
M_MOON = 7.342e22
EPS = 1e-8                      # reference eps (negligible at raw scales ~1e5)
LAMBDA_DATA = 1.0
LAMBDA_PHYSICS = 0.1

_GME = G * M_EARTH
_GMM = G * M_MOON

# packed channel order:
#  0-2  pred xyz | 3-5 true xyz | 6-8 prev-pos xyz | 9-11 prev-vel xyz
#  12-14 moon xyz | 15 mission phase (cast to f32)


def _pil_kernel(dt_ref, pk_ref, out_ref, *, b_true, tiles_per_split):
    """Partial-sum kernel for one (8, tl) batch slab.

    dt_ref  : (1,) f32 in SMEM
    pk_ref  : (16, 8, tl) f32 packed SoA tile (channel, sublane, lane)
    out_ref : (8, 128) f32 resident per-split accumulator:
              row 0 = sum((pred-true)^2), row 1 = sum((pred_raw-phys_pred)^2),
              row 2 = sum(phase weights)  (values replicated across lanes)
    """
    c = pl.program_id(0)
    i = pl.program_id(1)
    tl = pk_ref.shape[2]
    spt = 8 * tl                              # batch samples per tile
    global_t = c * tiles_per_split + i        # global batch-tile index

    @pl.when(i == 0)
    def _init():
        out_ref[...] = jnp.zeros_like(out_ref)

    dt = dt_ref[0]
    half_dt2 = 0.5 * dt * dt

    def _accumulate(valid):
        px, py, pz = pk_ref[0], pk_ref[1], pk_ref[2]
        tx, ty, tz = pk_ref[3], pk_ref[4], pk_ref[5]
        ex, ey, ez = pk_ref[6] * 1e5, pk_ref[7] * 1e5, pk_ref[8] * 1e5
        vx, vy, vz = pk_ref[9] * 1e3, pk_ref[10] * 1e3, pk_ref[11] * 1e3
        mx, my, mz = pk_ref[12] * 1e5, pk_ref[13] * 1e5, pk_ref[14] * 1e5
        ph = pk_ref[15]

        # ---- data loss partial: (pred - true)^2 ----
        dx, dy, dz = px - tx, py - ty, pz - tz
        dsq = dx * dx + dy * dy + dz * dz

        # ---- two-body acceleration (rsqrt form, EUP) ----
        rmx, rmy, rmz = ex - mx, ey - my, ez - mz
        inv_er = lax.rsqrt(ex * ex + ey * ey + ez * ez)
        inv_mr = lax.rsqrt(rmx * rmx + rmy * rmy + rmz * rmz)
        inv_er3 = inv_er * inv_er * inv_er
        inv_mr3 = inv_mr * inv_mr * inv_mr
        ax = (_GME * ex) * inv_er3 + (_GMM * rmx) * inv_mr3
        ay = (_GME * ey) * inv_er3 + (_GMM * rmy) * inv_mr3
        az = (_GME * ez) * inv_er3 + (_GMM * rmz) * inv_mr3

        # ---- physics-propagated position (2nd-order kinematics) ----
        ppx = ex + vx * dt + ax * half_dt2
        ppy = ey + vy * dt + ay * half_dt2
        ppz = ez + vz * dt + az * half_dt2
        qx, qy, qz = px * 1e5 - ppx, py * 1e5 - ppy, pz * 1e5 - ppz
        psq = qx * qx + qy * qy + qz * qz

        # ---- adaptive mission-phase weights ----
        w = jnp.ones_like(ph)
        w = jnp.where(ph == 0.0, 2.0, w)
        w = jnp.where(ph == 2.0, 1.5, w)
        w = jnp.where(ph == 1.0, 0.5, w)

        if valid is not None:                  # only on the padded tail tile(s)
            dsq = jnp.where(valid, dsq, 0.0)
            psq = jnp.where(valid, psq, 0.0)
            w = jnp.where(valid, w, 0.0)

        def _rsum(x):                          # (8, tl) -> (1, 1)
            return jnp.sum(jnp.sum(x, axis=1, keepdims=True),
                           axis=0, keepdims=True)

        data_p, phys_p, w_p = _rsum(dsq), _rsum(psq), _rsum(w)

        # scatter the three partial sums to sublanes 0/1/2 of the accumulator
        sub = lax.broadcasted_iota(jnp.int32, (8, 128), 0)
        upd = (jnp.where(sub == 0, data_p, 0.0)
               + jnp.where(sub == 1, phys_p, 0.0)
               + jnp.where(sub == 2, w_p, 0.0))
        out_ref[...] = out_ref[...] + upd

    has_tail = (global_t + 1) * spt > b_true

    @pl.when(jnp.logical_not(has_tail))
    def _interior():                           # hot path: no masking work
        _accumulate(None)

    @pl.when(has_tail)
    def _tail():                               # mask padded batch entries
        sub_i = lax.broadcasted_iota(jnp.int32, (8, tl), 0)
        lane_i = lax.broadcasted_iota(jnp.int32, (8, tl), 1)
        valid = (global_t * spt + sub_i * tl + lane_i) < b_true
        _accumulate(valid)


def _cdiv(a, b):
    return (a + b - 1) // b


def _round_up(x, m):
    return ((x + m - 1) // m) * m


def physics_informed_loss(pred_pos, true_pos, sc_prev_pos, sc_prev_vel,
                          moon_pos, dt, mission_phase=None, *,
                          lambda_data=LAMBDA_DATA,
                          lambda_physics=LAMBDA_PHYSICS,
                          adaptive_weighting=True, block_lanes=8192):
    """Returns (total_loss, data_loss, physics_loss) as f32 scalars."""
    assert block_lanes % 128 == 0
    B = pred_pos.shape[0]

    # lanes per tile; one tile covers 8*tl batch samples (sublanes x lanes)
    tl = max(128, min(block_lanes, _round_up(_cdiv(B, 8), 128)))
    spt = 8 * tl
    nt = _cdiv(B, spt)
    nsplit = 2 if nt >= 2 else 1          # leading "parallel" axis (v7x: 2 TCs)
    ntc = _cdiv(nt, nsplit)
    nt_total = nsplit * ntc
    b_pad = nt_total * spt

    # ---- single fused SoA repack: (B, 16) -> (16, 8, nt_total*tl) ----
    if mission_phase is None:
        phase_col = jnp.zeros((B, 1), jnp.float32)
    else:
        phase_col = mission_phase.astype(jnp.float32).reshape(B, 1)
    feats = jnp.concatenate(
        [pred_pos.astype(jnp.float32), true_pos.astype(jnp.float32),
         sc_prev_pos.astype(jnp.float32), sc_prev_vel.astype(jnp.float32),
         moon_pos.astype(jnp.float32), phase_col], axis=1)          # (B, 16)
    feats = jnp.pad(feats, ((0, b_pad - B), (0, 0)))
    packed = jnp.transpose(feats.reshape(nt_total, 8, tl, 16), (3, 1, 0, 2))
    packed = packed.reshape(16, 8, nt_total * tl)

    dt_arr = jnp.asarray(dt, jnp.float32).reshape(1)

    parts = pl.pallas_call(
        functools.partial(_pil_kernel, b_true=B, tiles_per_split=ntc),
        out_shape=jax.ShapeDtypeStruct((nsplit * 8, 128), jnp.float32),
        grid_spec=pltpu.PrefetchScalarGridSpec(
            num_scalar_prefetch=0,
            grid=(nsplit, ntc),
            in_specs=[pl.BlockSpec(memory_space=pltpu.SMEM),        # dt (1,)
                      pl.BlockSpec((16, 8, tl),
                                   lambda c, i: (0, 0, c * ntc + i))],
            out_specs=pl.BlockSpec((8, 128), lambda c, i: (c, 0))),
        compiler_params=pltpu.CompilerParams(
            dimension_semantics=("parallel", "arbitrary"),
            vmem_limit_bytes=32 * 1024 * 1024),
    )(dt_arr, packed)

    # ---- tiny scalar finalize in the wrapper (merges per-split partials) ----
    parts = parts.reshape(nsplit, 8, 128)
    data_sum = jnp.sum(parts[:, 0, 0])
    phys_sum = jnp.sum(parts[:, 1, 0])
    w_sum = jnp.sum(parts[:, 2, 0])
    n_el = float(B * 3)
    data_loss = data_sum / n_el
    physics_loss = jnp.log(phys_sum / n_el + 1.0)
    if adaptive_weighting and mission_phase is not None:
        physics_weight = lambda_physics * (w_sum / float(B))
    else:
        physics_weight = lambda_physics
    total = lambda_data * data_loss + physics_weight * physics_loss
    return total, data_loss, physics_loss


def _reference(pred_pos, true_pos, sc_prev_pos, sc_prev_vel, moon_pos, dt, phase):
    """Pure-JAX reference replicating the PyTorch forward (for sanity check)."""
    data_loss = jnp.mean((pred_pos - true_pos) ** 2)
    pred_raw = pred_pos * 1e5
    pos_raw = sc_prev_pos * 1e5
    vel_raw = sc_prev_vel * 1e3
    moon_raw = moon_pos * 1e5
    e_vec = pos_raw
    m_vec = pos_raw - moon_raw
    e_r = jnp.sqrt(jnp.sum(e_vec ** 2, axis=1, keepdims=True)) + EPS
    m_r = jnp.sqrt(jnp.sum(m_vec ** 2, axis=1, keepdims=True)) + EPS
    acc = G * M_EARTH * e_vec / e_r ** 3 + G * M_MOON * m_vec / m_r ** 3
    phys_pred = pos_raw + vel_raw * dt + 0.5 * acc * dt ** 2
    physics_loss = jnp.log(jnp.mean((pred_raw - phys_pred) ** 2) + 1.0)
    w = jnp.ones_like(phase, dtype=jnp.float32)
    w = jnp.where(phase == 0, 2.0, w)
    w = jnp.where(phase == 2, 1.5, w)
    w = jnp.where(phase == 1, 0.5, w)
    physics_weight = LAMBDA_PHYSICS * jnp.mean(w)
    total = LAMBDA_DATA * data_loss + physics_weight * physics_loss
    return total, data_loss, physics_loss


def _make_inputs(key, B):
    k1, k2, k3, k4, k5, k6 = jax.random.split(key, 6)
    pred_pos = jax.random.normal(k1, (B, 3), jnp.float32)
    true_pos = pred_pos + 0.01 * jax.random.normal(k2, (B, 3), jnp.float32)
    sc_prev_pos = jax.random.normal(k3, (B, 3), jnp.float32)
    sc_prev_vel = jax.random.normal(k4, (B, 3), jnp.float32)
    moon_pos = 3.0 + jax.random.normal(k5, (B, 3), jnp.float32)
    mission_phase = jax.random.randint(k6, (B,), 0, 3, jnp.int32)
    return pred_pos, true_pos, sc_prev_pos, sc_prev_vel, moon_pos, mission_phase


def _check(key, B, dt, block_lanes):
    args = _make_inputs(key, B)
    pred_pos, true_pos, sc_prev_pos, sc_prev_vel, moon_pos, mission_phase = args
    total, data, phys = physics_informed_loss(
        pred_pos, true_pos, sc_prev_pos, sc_prev_vel, moon_pos, dt,
        mission_phase, block_lanes=block_lanes)
    jax.block_until_ready((total, data, phys))
    rt, rd, rp = _reference(pred_pos, true_pos, sc_prev_pos, sc_prev_vel,
                            moon_pos, dt, mission_phase)
    assert jnp.allclose(total, rt, rtol=1e-4, atol=1e-5), (B, total, rt)
    assert jnp.allclose(data, rd, rtol=1e-4, atol=1e-6), (B, data, rd)
    assert jnp.allclose(phys, rp, rtol=1e-4, atol=1e-5), (B, phys, rp)

    # non-adaptive path (mission_phase=None): physics_weight == lambda_physics
    t2, d2, p2 = physics_informed_loss(
        pred_pos, true_pos, sc_prev_pos, sc_prev_vel, moon_pos, dt, None,
        block_lanes=block_lanes)
    jax.block_until_ready((t2, d2, p2))
    rt2 = LAMBDA_DATA * rd + LAMBDA_PHYSICS * rp
    assert jnp.allclose(t2, rt2, rtol=1e-4, atol=1e-5), (B, t2, rt2)


if __name__ == "__main__":
    key = jax.random.PRNGKey(0)
    k_small, k_multi = jax.random.split(key)

    # small shape consistent with the module (batch=8, xyz=3): single tile
    _check(k_small, B=8, dt=10.0, block_lanes=8192)

    # multi-tile path: exercises the split "parallel" axis, per-split
    # accumulation, the unmasked interior path and the masked padded tail
    _check(k_multi, B=3000, dt=10.0, block_lanes=128)

    print("KERNEL_OK")
</pallas_src>

<mosaic_0001>
module attributes {stable_mosaic.version = 11 : i64} {
  func.func @_pil_kernel(%arg0: i32, %arg1: i32, %arg2: memref<1xf32, #tpu.memory_space<smem>>, %arg3: memref<16x8x128xf32, #tpu.memory_space<vmem>>, %arg4: memref<8x128xf32, #tpu.memory_space<vmem>>) attributes {dimension_semantics = [#tpu.dimension_semantics<parallel>, #tpu.dimension_semantics<arbitrary>], iteration_bounds = array<i64: 1, 1>, scalar_prefetch = 0 : i64, scratch_operands = 0 : i64, tpu.core_type = #tpu.core_type<tc>, window_params = [{transform_indices = @transform_0, window_bounds = array<i64: 1>}, {transform_indices = @transform_1, window_bounds = array<i64: 16, 8, 128>}, {transform_indices = @transform_2, window_bounds = array<i64: 8, 128>}]} {
    %c1_i32 = arith.constant 1 : i32
    %0 = arith.muli %arg0, %c1_i32 : i32
    %1 = arith.addi %0, %arg1 : i32
    %c0_i32 = arith.constant 0 : i32
    %2 = arith.cmpi eq, %arg1, %c0_i32 : i32
    %3 = arith.extui %2 : i1 to i32
    %c0_i32_0 = arith.constant 0 : i32
    %4 = arith.cmpi ne, %3, %c0_i32_0 : i32
    scf.if %4 {
      %cst_4 = arith.constant 0.000000e+00 : f32
      %16 = vector.broadcast %cst_4 : f32 to vector<8x128xf32>
      %c0_5 = arith.constant 0 : index
      %c0_6 = arith.constant 0 : index
      %17 = vector.load %arg4[%c0_5, %c0_6] : memref<8x128xf32, #tpu.memory_space<vmem>>, vector<8x128xf32>
      tpu.vector_store %arg4[%c0_5, %c0_6], %16 {strides = array<i32>} : memref<8x128xf32, #tpu.memory_space<vmem>>, vector<8x128xf32>,
    } else {
    }
    %c0 = arith.constant 0 : index
    %5 = memref.load %arg2[%c0] : memref<1xf32, #tpu.memory_space<smem>>
    %cst = arith.constant 5.000000e-01 : f32
    %6 = arith.mulf %cst, %5 : f32
    %7 = arith.mulf %6, %5 : f32
    %c1_i32_1 = arith.constant 1 : i32
    %8 = arith.addi %1, %c1_i32_1 : i32
    %c1024_i32 = arith.constant 1024 : i32
    %9 = arith.muli %8, %c1024_i32 : i32
    %c8_i32 = arith.constant 8 : i32
    %10 = arith.cmpi sgt, %9, %c8_i32 : i32
    %true = arith.constant true
    %11 = arith.xori %10, %true : i1
    %12 = arith.extui %11 : i1 to i32
    %c0_i32_2 = arith.constant 0 : i32
    %13 = arith.cmpi ne, %12, %c0_i32_2 : i32
    scf.if %13 {
      %c0_4 = arith.constant 0 : index
      %c0_5 = arith.constant 0 : index
      %c0_6 = arith.constant 0 : index
      %16 = vector.load %arg3[%c0_4, %c0_5, %c0_6] : memref<16x8x128xf32, #tpu.memory_space<vmem>>, vector<1x8x128xf32>
      %17 = vector.shape_cast %16 : vector<1x8x128xf32> to vector<8x128xf32>
      %c1 = arith.constant 1 : index
      %c0_7 = arith.constant 0 : index
      %c0_8 = arith.constant 0 : index
      %18 = vector.load %arg3[%c1, %c0_7, %c0_8] : memref<16x8x128xf32, #tpu.memory_space<vmem>>, vector<1x8x128xf32>
      %19 = vector.shape_cast %18 : vector<1x8x128xf32> to vector<8x128xf32>
      %c2 = arith.constant 2 : index
      %c0_9 = arith.constant 0 : index
      %c0_10 = arith.constant 0 : index
      %20 = vector.load %arg3[%c2, %c0_9, %c0_10] : memref<16x8x128xf32, #tpu.memory_space<vmem>>, vector<1x8x128xf32>
      %21 = vector.shape_cast %20 : vector<1x8x128xf32> to vector<8x128xf32>
      %c3 = arith.constant 3 : index
      %c0_11 = arith.constant 0 : index
      %c0_12 = arith.constant 0 : index
      %22 = vector.load %arg3[%c3, %c0_11, %c0_12] : memref<16x8x128xf32, #tpu.memory_space<vmem>>, vector<1x8x128xf32>
      %23 = vector.shape_cast %22 : vector<1x8x128xf32> to vector<8x128xf32>
      %c4 = arith.constant 4 : index
      %c0_13 = arith.constant 0 : index
      %c0_14 = arith.constant 0 : index
      %24 = vector.load %arg3[%c4, %c0_13, %c0_14] : memref<16x8x128xf32, #tpu.memory_space<vmem>>, vector<1x8x128xf32>
      %25 = vector.shape_cast %24 : vector<1x8x128xf32> to vector<8x128xf32>
      %c5 = arith.constant 5 : index
      %c0_15 = arith.constant 0 : index
      %c0_16 = arith.constant 0 : index
      %26 = vector.load %arg3[%c5, %c0_15, %c0_16] : memref<16x8x128xf32, #tpu.memory_space<vmem>>, vector<1x8x128xf32>
      %27 = vector.shape_cast %26 : vector<1x8x128xf32> to vector<8x128xf32>
      %c6 = arith.constant 6 : index
      %c0_17 = arith.constant 0 : index
      %c0_18 = arith.constant 0 : index
      %28 = vector.load %arg3[%c6, %c0_17, %c0_18] : memref<16x8x128xf32, #tpu.memory_space<vmem>>, vector<1x8x128xf32>
      %29 = vector.shape_cast %28 : vector<1x8x128xf32> to vector<8x128xf32>
      %cst_19 = arith.constant 1.000000e+05 : f32
      %30 = vector.broadcast %cst_19 : f32 to vector<8x128xf32>
      %31 = arith.mulf %29, %30 : vector<8x128xf32>
      %c7 = arith.constant 7 : index
      %c0_20 = arith.constant 0 : index
      %c0_21 = arith.constant 0 : index
      %32 = vector.load %arg3[%c7, %c0_20, %c0_21] : memref<16x8x128xf32, #tpu.memory_space<vmem>>, vector<1x8x128xf32>
      %33 = vector.shape_cast %32 : vector<1x8x128xf32> to vector<8x128xf32>
      %cst_22 = arith.constant 1.000000e+05 : f32
      %34 = vector.broadcast %cst_22 : f32 to vector<8x128xf32>
      %35 = arith.mulf %33, %34 : vector<8x128xf32>
      %c8 = arith.constant 8 : index
      %c0_23 = arith.constant 0 : index
      %c0_24 = arith.constant 0 : index
      %36 = vector.load %arg3[%c8, %c0_23, %c0_24] : memref<16x8x128xf32, #tpu.memory_space<vmem>>, vector<1x8x128xf32>
      %37 = vector.shape_cast %36 : vector<1x8x128xf32> to vector<8x128xf32>
      %cst_25 = arith.constant 1.000000e+05 : f32
      %38 = vector.broadcast %cst_25 : f32 to vector<8x128xf32>
      %39 = arith.mulf %37, %38 : vector<8x128xf32>
      %c9 = arith.constant 9 : index
      %c0_26 = arith.constant 0 : index
      %c0_27 = arith.constant 0 : index
      %40 = vector.load %arg3[%c9, %c0_26, %c0_27] : memref<16x8x128xf32, #tpu.memory_space<vmem>>, vector<1x8x128xf32>
      %41 = vector.shape_cast %40 : vector<1x8x128xf32> to vector<8x128xf32>
      %cst_28 = arith.constant 1.000000e+03 : f32
      %42 = vector.broadcast %cst_28 : f32 to vector<8x128xf32>
      %43 = arith.mulf %41, %42 : vector<8x128xf32>
      %c10 = arith.constant 10 : index
      %c0_29 = arith.constant 0 : index
      %c0_30 = arith.constant 0 : index
      %44 = vector.load %arg3[%c10, %c0_29, %c0_30] : memref<16x8x128xf32, #tpu.memory_space<vmem>>, vector<1x8x128xf32>
      %45 = vector.shape_cast %44 : vector<1x8x128xf32> to vector<8x128xf32>
      %cst_31 = arith.constant 1.000000e+03 : f32
      %46 = vector.broadcast %cst_31 : f32 to vector<8x128xf32>
      %47 = arith.mulf %45, %46 : vector<8x128xf32>
      %c11 = arith.constant 11 : index
      %c0_32 = arith.constant 0 : index
      %c0_33 = arith.constant 0 : index
      %48 = vector.load %arg3[%c11, %c0_32, %c0_33] : memref<16x8x128xf32, #tpu.memory_space<vmem>>, vector<1x8x128xf32>
      %49 = vector.shape_cast %48 : vector<1x8x128xf32> to vector<8x128xf32>
      %cst_34 = arith.constant 1.000000e+03 : f32
      %50 = vector.broadcast %cst_34 : f32 to vector<8x128xf32>
      %51 = arith.mulf %49, %50 : vector<8x128xf32>
      %c12 = arith.constant 12 : index
      %c0_35 = arith.constant 0 : index
      %c0_36 = arith.constant 0 : index
      %52 = vector.load %arg3[%c12, %c0_35, %c0_36] : memref<16x8x128xf32, #tpu.memory_space<vmem>>, vector<1x8x128xf32>
      %53 = vector.shape_cast %52 : vector<1x8x128xf32> to vector<8x128xf32>
      %cst_37 = arith.constant 1.000000e+05 : f32
      %54 = vector.broadcast %cst_37 : f32 to vector<8x128xf32>
      %55 = arith.mulf %53, %54 : vector<8x128xf32>
      %c13 = arith.constant 13 : index
      %c0_38 = arith.constant 0 : index
      %c0_39 = arith.constant 0 : index
      %56 = vector.load %arg3[%c13, %c0_38, %c0_39] : memref<16x8x128xf32, #tpu.memory_space<vmem>>, vector<1x8x128xf32>
      %57 = vector.shape_cast %56 : vector<1x8x128xf32> to vector<8x128xf32>
      %cst_40 = arith.constant 1.000000e+05 : f32
      %58 = vector.broadcast %cst_40 : f32 to vector<8x128xf32>
      %59 = arith.mulf %57, %58 : vector<8x128xf32>
      %c14 = arith.constant 14 : index
      %c0_41 = arith.constant 0 : index
      %c0_42 = arith.constant 0 : index
      %60 = vector.load %arg3[%c14, %c0_41, %c0_42] : memref<16x8x128xf32, #tpu.memory_space<vmem>>, vector<1x8x128xf32>
      %61 = vector.shape_cast %60 : vector<1x8x128xf32> to vector<8x128xf32>
      %cst_43 = arith.constant 1.000000e+05 : f32
      %62 = vector.broadcast %cst_43 : f32 to vector<8x128xf32>
      %63 = arith.mulf %61, %62 : vector<8x128xf32>
      %c15 = arith.constant 15 : index
      %c0_44 = arith.constant 0 : index
      %c0_45 = arith.constant 0 : index
      %64 = vector.load %arg3[%c15, %c0_44, %c0_45] : memref<16x8x128xf32, #tpu.memory_space<vmem>>, vector<1x8x128xf32>
      %65 = vector.shape_cast %64 : vector<1x8x128xf32> to vector<8x128xf32>
      %66 = arith.subf %17, %23 : vector<8x128xf32>
      %67 = arith.subf %19, %25 : vector<8x128xf32>
      %68 = arith.subf %21, %27 : vector<8x128xf32>
      %69 = arith.mulf %66, %66 : vector<8x128xf32>
      %70 = arith.mulf %67, %67 : vector<8x128xf32>
      %71 = arith.addf %69, %70 : vector<8x128xf32>
      %72 = arith.mulf %68, %68 : vector<8x128xf32>
      %73 = arith.addf %71, %72 : vector<8x128xf32>
      %74 = arith.subf %31, %55 : vector<8x128xf32>
      %75 = arith.subf %35, %59 : vector<8x128xf32>
      %76 = arith.subf %39, %63 : vector<8x128xf32>
      %77 = arith.mulf %31, %31 : vector<8x128xf32>
      %78 = arith.mulf %35, %35 : vector<8x128xf32>
      %79 = arith.addf %77, %78 : vector<8x128xf32>
      %80 = arith.mulf %39, %39 : vector<8x128xf32>
      %81 = arith.addf %79, %80 : vector<8x128xf32>
      %82 = math.rsqrt %81 : vector<8x128xf32>
      %83 = arith.mulf %74, %74 : vector<8x128xf32>
      %84 = arith.mulf %75, %75 : vector<8x128xf32>
      %85 = arith.addf %83, %84 : vector<8x128xf32>
      %86 = arith.mulf %76, %76 : vector<8x128xf32>
      %87 = arith.addf %85, %86 : vector<8x128xf32>
      %88 = math.rsqrt %87 : vector<8x128xf32>
      %89 = arith.mulf %82, %82 : vector<8x128xf32>
      %90 = arith.mulf %89, %82 : vector<8x128xf32>
      %91 = arith.mulf %88, %88 : vector<8x128xf32>
      %92 = arith.mulf %91, %88 : vector<8x128xf32>
      %cst_46 = arith.constant 3.98589205E+14 : f32
      %93 = vector.broadcast %cst_46 : f32 to vector<8x128xf32>
      %94 = arith.mulf %93, %31 : vector<8x128xf32>
      %95 = arith.mulf %94, %90 : vector<8x128xf32>
      %cst_47 = arith.constant 4.9002709E+12 : f32
      %96 = vector.broadcast %cst_47 : f32 to vector<8x128xf32>
      %97 = arith.mulf %96, %74 : vector<8x128xf32>
      %98 = arith.mulf %97, %92 : vector<8x128xf32>
      %99 = arith.addf %95, %98 : vector<8x128xf32>
      %cst_48 = arith.constant 3.98589205E+14 : f32
      %100 = vector.broadcast %cst_48 : f32 to vector<8x128xf32>
      %101 = arith.mulf %100, %35 : vector<8x128xf32>
      %102 = arith.mulf %101, %90 : vector<8x128xf32>
      %cst_49 = arith.constant 4.9002709E+12 : f32
      %103 = vector.broadcast %cst_49 : f32 to vector<8x128xf32>
      %104 = arith.mulf %103, %75 : vector<8x128xf32>
      %105 = arith.mulf %104, %92 : vector<8x128xf32>
      %106 = arith.addf %102, %105 : vector<8x128xf32>
      %cst_50 = arith.constant 3.98589205E+14 : f32
      %107 = vector.broadcast %cst_50 : f32 to vector<8x128xf32>
      %108 = arith.mulf %107, %39 : vector<8x128xf32>
      %109 = arith.mulf %108, %90 : vector<8x128xf32>
      %cst_51 = arith.constant 4.9002709E+12 : f32
      %110 = vector.broadcast %cst_51 : f32 to vector<8x128xf32>
      %111 = arith.mulf %110, %76 : vector<8x128xf32>
      %112 = arith.mulf %111, %92 : vector<8x128xf32>
      %113 = arith.addf %109, %112 : vector<8x128xf32>
      %114 = vector.broadcast %5 : f32 to vector<8x128xf32>
      %115 = arith.mulf %43, %114 : vector<8x128xf32>
      %116 = arith.addf %31, %115 : vector<8x128xf32>
      %117 = vector.broadcast %7 : f32 to vector<8x128xf32>
      %118 = arith.mulf %99, %117 : vector<8x128xf32>
      %119 = arith.addf %116, %118 : vector<8x128xf32>
      %120 = vector.broadcast %5 : f32 to vector<8x128xf32>
      %121 = arith.mulf %47, %120 : vector<8x128xf32>
      %122 = arith.addf %35, %121 : vector<8x128xf32>
      %123 = vector.broadcast %7 : f32 to vector<8x128xf32>
      %124 = arith.mulf %106, %123 : vector<8x128xf32>
      %125 = arith.addf %122, %124 : vector<8x128xf32>
      %126 = vector.broadcast %5 : f32 to vector<8x128xf32>
      %127 = arith.mulf %51, %126 : vector<8x128xf32>
      %128 = arith.addf %39, %127 : vector<8x128xf32>
      %129 = vector.broadcast %7 : f32 to vector<8x128xf32>
      %130 = arith.mulf %113, %129 : vector<8x128xf32>
      %131 = arith.addf %128, %130 : vector<8x128xf32>
      %cst_52 = arith.constant 1.000000e+05 : f32
      %132 = vector.broadcast %cst_52 : f32 to vector<8x128xf32>
      %133 = arith.mulf %17, %132 : vector<8x128xf32>
      %134 = arith.subf %133, %119 : vector<8x128xf32>
      %cst_53 = arith.constant 1.000000e+05 : f32
      %135 = vector.broadcast %cst_53 : f32 to vector<8x128xf32>
      %136 = arith.mulf %19, %135 : vector<8x128xf32>
      %137 = arith.subf %136, %125 : vector<8x128xf32>
      %cst_54 = arith.constant 1.000000e+05 : f32
      %138 = vector.broadcast %cst_54 : f32 to vector<8x128xf32>
      %139 = arith.mulf %21, %138 : vector<8x128xf32>
      %140 = arith.subf %139, %131 : vector<8x128xf32>
      %141 = arith.mulf %134, %134 : vector<8x128xf32>
      %142 = arith.mulf %137, %137 : vector<8x128xf32>
      %143 = arith.addf %141, %142 : vector<8x128xf32>
      %144 = arith.mulf %140, %140 : vector<8x128xf32>
      %145 = arith.addf %143, %144 : vector<8x128xf32>
      %cst_55 = arith.constant 1.000000e+00 : f32
      %146 = vector.broadcast %cst_55 : f32 to vector<8x128xf32>
      %cst_56 = arith.constant 0.000000e+00 : f32
      %147 = vector.broadcast %cst_56 : f32 to vector<8x128xf32>
      %148 = arith.cmpf oeq, %65, %147 : vector<8x128xf32>
      %cst_57 = arith.constant 2.000000e+00 : f32
      %149 = vector.broadcast %cst_57 : f32 to vector<8x128xf32>
      %150 = arith.select %148, %149, %146 : vector<8x128xi1>, vector<8x128xf32>
      %cst_58 = arith.constant 2.000000e+00 : f32
      %151 = vector.broadcast %cst_58 : f32 to vector<8x128xf32>
      %152 = arith.cmpf oeq, %65, %151 : vector<8x128xf32>
      %cst_59 = arith.constant 1.500000e+00 : f32
      %153 = vector.broadcast %cst_59 : f32 to vector<8x128xf32>
      %154 = arith.select %152, %153, %150 : vector<8x128xi1>, vector<8x128xf32>
      %cst_60 = arith.constant 1.000000e+00 : f32
      %155 = vector.broadcast %cst_60 : f32 to vector<8x128xf32>
      %156 = arith.cmpf oeq, %65, %155 : vector<8x128xf32>
      %cst_61 = arith.constant 5.000000e-01 : f32
      %157 = vector.broadcast %cst_61 : f32 to vector<8x128xf32>
      %158 = arith.select %156, %157, %154 : vector<8x128xi1>, vector<8x128xf32>
      %cst_62 = arith.constant dense<0.000000e+00> : vector<8xf32>
      %159 = vector.multi_reduction <add>, %73, %cst_62 [1] : vector<8x128xf32> to vector<8xf32>
      %160 = vector.shape_cast %159 : vector<8xf32> to vector<8x1xf32>
      %cst_63 = arith.constant dense<0.000000e+00> : vector<1xf32>
      %161 = vector.multi_reduction <add>, %160, %cst_63 [0] : vector<8x1xf32> to vector<1xf32>
      %162 = vector.shape_cast %161 : vector<1xf32> to vector<1x1xf32>
      %cst_64 = arith.constant dense<0.000000e+00> : vector<8xf32>
      %163 = vector.multi_reduction <add>, %145, %cst_64 [1] : vector<8x128xf32> to vector<8xf32>
      %164 = vector.shape_cast %163 : vector<8xf32> to vector<8x1xf32>
      %cst_65 = arith.constant dense<0.000000e+00> : vector<1xf32>
      %165 = vector.multi_reduction <add>, %164, %cst_65 [0] : vector<8x1xf32> to vector<1xf32>
      %166 = vector.shape_cast %165 : vector<1xf32> to vector<1x1xf32>
      %cst_66 = arith.constant dense<0.000000e+00> : vector<8xf32>
      %167 = vector.multi_reduction <add>, %158, %cst_66 [1] : vector<8x128xf32> to vector<8xf32>
      %168 = vector.shape_cast %167 : vector<8xf32> to vector<8x1xf32>
      %cst_67 = arith.constant dense<0.000000e+00> : vector<1xf32>
      %169 = vector.multi_reduction <add>, %168, %cst_67 [0] : vector<8x1xf32> to vector<1xf32>
      %170 = vector.shape_cast %169 : vector<1xf32> to vector<1x1xf32>
      %171 = tpu.iota {dimensions = array<i32: 0>} : vector<8x128xi32>
      %c0_i32_68 = arith.constant 0 : i32
      %172 = vector.broadcast %c0_i32_68 : i32 to vector<8x128xi32>
      %173 = arith.cmpi eq, %171, %172 : vector<8x128xi32>
      %cst_69 = arith.constant 0.000000e+00 : f32
      %174 = vector.shape_cast %162 : vector<1x1xf32> to vector<1x1xf32>
      %175 = vector.broadcast %174 : vector<1x1xf32> to vector<8x128xf32>
      %176 = vector.broadcast %cst_69 : f32 to vector<8x128xf32>
      %177 = arith.select %173, %175, %176 : vector<8x128xi1>, vector<8x128xf32>
      %c1_i32_70 = arith.constant 1 : i32
      %178 = vector.broadcast %c1_i32_70 : i32 to vector<8x128xi32>
      %179 = arith.cmpi eq, %171, %178 : vector<8x128xi32>
      %cst_71 = arith.constant 0.000000e+00 : f32
      %180 = vector.shape_cast %166 : vector<1x1xf32> to vector<1x1xf32>
      %181 = vector.broadcast %180 : vector<1x1xf32> to vector<8x128xf32>
      %182 = vector.broadcast %cst_71 : f32 to vector<8x128xf32>
      %183 = arith.select %179, %181, %182 : vector<8x128xi1>, vector<8x128xf32>
      %184 = arith.addf %177, %183 : vector<8x128xf32>
      %c2_i32 = arith.constant 2 : i32
      %185 = vector.broadcast %c2_i32 : i32 to vector<8x128xi32>
      %186 = arith.cmpi eq, %171, %185 : vector<8x128xi32>
      %cst_72 = arith.constant 0.000000e+00 : f32
      %187 = vector.shape_cast %170 : vector<1x1xf32> to vector<1x1xf32>
      %188 = vector.broadcast %187 : vector<1x1xf32> to vector<8x128xf32>
      %189 = vector.broadcast %cst_72 : f32 to vector<8x128xf32>
      %190 = arith.select %186, %188, %189 : vector<8x128xi1>, vector<8x128xf32>
      %191 = arith.addf %184, %190 : vector<8x128xf32>
      %c0_73 = arith.constant 0 : index
      %c0_74 = arith.constant 0 : index
      %192 = vector.load %arg4[%c0_73, %c0_74] : memref<8x128xf32, #tpu.memory_space<vmem>>, vector<8x128xf32>
      %193 = arith.addf %192, %191 : vector<8x128xf32>
      %c0_75 = arith.constant 0 : index
      %c0_76 = arith.constant 0 : index
      %194 = vector.load %arg4[%c0_75, %c0_76] : memref<8x128xf32, #tpu.memory_space<vmem>>, vector<8x128xf32>
      tpu.vector_store %arg4[%c0_75, %c0_76], %193 {strides = array<i32>} : memref<8x128xf32, #tpu.memory_space<vmem>>, vector<8x128xf32>,
    } else {
    }
    %14 = arith.extui %10 : i1 to i32
    %c0_i32_3 = arith.constant 0 : i32
    %15 = arith.cmpi ne, %14, %c0_i32_3 : i32
    scf.if %15 {
      %16 = tpu.iota {dimensions = array<i32: 0>} : vector<8x128xi32>
      %17 = tpu.iota {dimensions = array<i32: 1>} : vector<8x128xi32>
      %c1024_i32_4 = arith.constant 1024 : i32
      %18 = arith.muli %1, %c1024_i32_4 : i32
      %c128_i32 = arith.constant 128 : i32
      %19 = vector.broadcast %c128_i32 : i32 to vector<8x128xi32>
      %20 = arith.muli %16, %19 : vector<8x128xi32>
      %21 = vector.broadcast %18 : i32 to vector<8x128xi32>
      %22 = arith.addi %21, %20 : vector<8x128xi32>
      %23 = arith.addi %22, %17 : vector<8x128xi32>
      %c8_i32_5 = arith.constant 8 : i32
      %24 = vector.broadcast %c8_i32_5 : i32 to vector<8x128xi32>
      %25 = arith.cmpi slt, %23, %24 : vector<8x128xi32>
      %c0_6 = arith.constant 0 : index
      %c0_7 = arith.constant 0 : index
      %c0_8 = arith.constant 0 : index
      %26 = vector.load %arg3[%c0_6, %c0_7, %c0_8] : memref<16x8x128xf32, #tpu.memory_space<vmem>>, vector<1x8x128xf32>
      %27 = vector.shape_cast %26 : vector<1x8x128xf32> to vector<8x128xf32>
      %c1 = arith.constant 1 : index
      %c0_9 = arith.constant 0 : index
      %c0_10 = arith.constant 0 : index
      %28 = vector.load %arg3[%c1, %c0_9, %c0_10] : memref<16x8x128xf32, #tpu.memory_space<vmem>>, vector<1x8x128xf32>
      %29 = vector.shape_cast %28 : vector<1x8x128xf32> to vector<8x128xf32>
      %c2 = arith.constant 2 : index
      %c0_11 = arith.constant 0 : index
      %c0_12 = arith.constant 0 : index
      %30 = vector.load %arg3[%c2, %c0_11, %c0_12] : memref<16x8x128xf32, #tpu.memory_space<vmem>>, vector<1x8x128xf32>
      %31 = vector.shape_cast %30 : vector<1x8x128xf32> to vector<8x128xf32>
      %c3 = arith.constant 3 : index
      %c0_13 = arith.constant 0 : index
      %c0_14 = arith.constant 0 : index
      %32 = vector.load %arg3[%c3, %c0_13, %c0_14] : memref<16x8x128xf32, #tpu.memory_space<vmem>>, vector<1x8x128xf32>
      %33 = vector.shape_cast %32 : vector<1x8x128xf32> to vector<8x128xf32>
      %c4 = arith.constant 4 : index
      %c0_15 = arith.constant 0 : index
      %c0_16 = arith.constant 0 : index
      %34 = vector.load %arg3[%c4, %c0_15, %c0_16] : memref<16x8x128xf32, #tpu.memory_space<vmem>>, vector<1x8x128xf32>
      %35 = vector.shape_cast %34 : vector<1x8x128xf32> to vector<8x128xf32>
      %c5 = arith.constant 5 : index
      %c0_17 = arith.constant 0 : index
      %c0_18 = arith.constant 0 : index
      %36 = vector.load %arg3[%c5, %c0_17, %c0_18] : memref<16x8x128xf32, #tpu.memory_space<vmem>>, vector<1x8x128xf32>
      %37 = vector.shape_cast %36 : vector<1x8x128xf32> to vector<8x128xf32>
      %c6 = arith.constant 6 : index
      %c0_19 = arith.constant 0 : index
      %c0_20 = arith.constant 0 : index
      %38 = vector.load %arg3[%c6, %c0_19, %c0_20] : memref<16x8x128xf32, #tpu.memory_space<vmem>>, vector<1x8x128xf32>
      %39 = vector.shape_cast %38 : vector<1x8x128xf32> to vector<8x128xf32>
      %cst_21 = arith.constant 1.000000e+05 : f32
      %40 = vector.broadcast %cst_21 : f32 to vector<8x128xf32>
      %41 = arith.mulf %39, %40 : vector<8x128xf32>
      %c7 = arith.constant 7 : index
      %c0_22 = arith.constant 0 : index
      %c0_23 = arith.constant 0 : index
      %42 = vector.load %arg3[%c7, %c0_22, %c0_23] : memref<16x8x128xf32, #tpu.memory_space<vmem>>, vector<1x8x128xf32>
      %43 = vector.shape_cast %42 : vector<1x8x128xf32> to vector<8x128xf32>
      %cst_24 = arith.constant 1.000000e+05 : f32
      %44 = vector.broadcast %cst_24 : f32 to vector<8x128xf32>
      %45 = arith.mulf %43, %44 : vector<8x128xf32>
      %c8 = arith.constant 8 : index
      %c0_25 = arith.constant 0 : index
      %c0_26 = arith.constant 0 : index
      %46 = vector.load %arg3[%c8, %c0_25, %c0_26] : memref<16x8x128xf32, #tpu.memory_space<vmem>>, vector<1x8x128xf32>
      %47 = vector.shape_cast %46 : vector<1x8x128xf32> to vector<8x128xf32>
      %cst_27 = arith.constant 1.000000e+05 : f32
      %48 = vector.broadcast %cst_27 : f32 to vector<8x128xf32>
      %49 = arith.mulf %47, %48 : vector<8x128xf32>
      %c9 = arith.constant 9 : index
      %c0_28 = arith.constant 0 : index
      %c0_29 = arith.constant 0 : index
      %50 = vector.load %arg3[%c9, %c0_28, %c0_29] : memref<16x8x128xf32, #tpu.memory_space<vmem>>, vector<1x8x128xf32>
      %51 = vector.shape_cast %50 : vector<1x8x128xf32> to vector<8x128xf32>
      %cst_30 = arith.constant 1.000000e+03 : f32
      %52 = vector.broadcast %cst_30 : f32 to vector<8x128xf32>
      %53 = arith.mulf %51, %52 : vector<8x128xf32>
      %c10 = arith.constant 10 : index
      %c0_31 = arith.constant 0 : index
      %c0_32 = arith.constant 0 : index
      %54 = vector.load %arg3[%c10, %c0_31, %c0_32] : memref<16x8x128xf32, #tpu.memory_space<vmem>>, vector<1x8x128xf32>
      %55 = vector.shape_cast %54 : vector<1x8x128xf32> to vector<8x128xf32>
      %cst_33 = arith.constant 1.000000e+03 : f32
      %56 = vector.broadcast %cst_33 : f32 to vector<8x128xf32>
      %57 = arith.mulf %55, %56 : vector<8x128xf32>
      %c11 = arith.constant 11 : index
      %c0_34 = arith.constant 0 : index
      %c0_35 = arith.constant 0 : index
      %58 = vector.load %arg3[%c11, %c0_34, %c0_35] : memref<16x8x128xf32, #tpu.memory_space<vmem>>, vector<1x8x128xf32>
      %59 = vector.shape_cast %58 : vector<1x8x128xf32> to vector<8x128xf32>
      %cst_36 = arith.constant 1.000000e+03 : f32
      %60 = vector.broadcast %cst_36 : f32 to vector<8x128xf32>
      %61 = arith.mulf %59, %60 : vector<8x128xf32>
      %c12 = arith.constant 12 : index
      %c0_37 = arith.constant 0 : index
      %c0_38 = arith.constant 0 : index
      %62 = vector.load %arg3[%c12, %c0_37, %c0_38] : memref<16x8x128xf32, #tpu.memory_space<vmem>>, vector<1x8x128xf32>
      %63 = vector.shape_cast %62 : vector<1x8x128xf32> to vector<8x128xf32>
      %cst_39 = arith.constant 1.000000e+05 : f32
      %64 = vector.broadcast %cst_39 : f32 to vector<8x128xf32>
      %65 = arith.mulf %63, %64 : vector<8x128xf32>
      %c13 = arith.constant 13 : index
      %c0_40 = arith.constant 0 : index
      %c0_41 = arith.constant 0 : index
      %66 = vector.load %arg3[%c13, %c0_40, %c0_41] : memref<16x8x128xf32, #tpu.memory_space<vmem>>, vector<1x8x128xf32>
      %67 = vector.shape_cast %66 : vector<1x8x128xf32> to vector<8x128xf32>
      %cst_42 = arith.constant 1.000000e+05 : f32
      %68 = vector.broadcast %cst_42 : f32 to vector<8x128xf32>
      %69 = arith.mulf %67, %68 : vector<8x128xf32>
      %c14 = arith.constant 14 : index
      %c0_43 = arith.constant 0 : index
      %c0_44 = arith.constant 0 : index
      %70 = vector.load %arg3[%c14, %c0_43, %c0_44] : memref<16x8x128xf32, #tpu.memory_space<vmem>>, vector<1x8x128xf32>
      %71 = vector.shape_cast %70 : vector<1x8x128xf32> to vector<8x128xf32>
      %cst_45 = arith.constant 1.000000e+05 : f32
      %72 = vector.broadcast %cst_45 : f32 to vector<8x128xf32>
      %73 = arith.mulf %71, %72 : vector<8x128xf32>
      %c15 = arith.constant 15 : index
      %c0_46 = arith.constant 0 : index
      %c0_47 = arith.constant 0 : index
      %74 = vector.load %arg3[%c15, %c0_46, %c0_47] : memref<16x8x128xf32, #tpu.memory_space<vmem>>, vector<1x8x128xf32>
      %75 = vector.shape_cast %74 : vector<1x8x128xf32> to vector<8x128xf32>
      %76 = arith.subf %27, %33 : vector<8x128xf32>
      %77 = arith.subf %29, %35 : vector<8x128xf32>
      %78 = arith.subf %31, %37 : vector<8x128xf32>
      %79 = arith.mulf %76, %76 : vector<8x128xf32>
      %80 = arith.mulf %77, %77 : vector<8x128xf32>
      %81 = arith.addf %79, %80 : vector<8x128xf32>
      %82 = arith.mulf %78, %78 : vector<8x128xf32>
      %83 = arith.addf %81, %82 : vector<8x128xf32>
      %84 = arith.subf %41, %65 : vector<8x128xf32>
      %85 = arith.subf %45, %69 : vector<8x128xf32>
      %86 = arith.subf %49, %73 : vector<8x128xf32>
      %87 = arith.mulf %41, %41 : vector<8x128xf32>
      %88 = arith.mulf %45, %45 : vector<8x128xf32>
      %89 = arith.addf %87, %88 : vector<8x128xf32>
      %90 = arith.mulf %49, %49 : vector<8x128xf32>
      %91 = arith.addf %89, %90 : vector<8x128xf32>
      %92 = math.rsqrt %91 : vector<8x128xf32>
      %93 = arith.mulf %84, %84 : vector<8x128xf32>
      %94 = arith.mulf %85, %85 : vector<8x128xf32>
      %95 = arith.addf %93, %94 : vector<8x128xf32>
      %96 = arith.mulf %86, %86 : vector<8x128xf32>
      %97 = arith.addf %95, %96 : vector<8x128xf32>
      %98 = math.rsqrt %97 : vector<8x128xf32>
      %99 = arith.mulf %92, %92 : vector<8x128xf32>
      %100 = arith.mulf %99, %92 : vector<8x128xf32>
      %101 = arith.mulf %98, %98 : vector<8x128xf32>
      %102 = arith.mulf %101, %98 : vector<8x128xf32>
      %cst_48 = arith.constant 3.98589205E+14 : f32
      %103 = vector.broadcast %cst_48 : f32 to vector<8x128xf32>
      %104 = arith.mulf %103, %41 : vector<8x128xf32>
      %105 = arith.mulf %104, %100 : vector<8x128xf32>
      %cst_49 = arith.constant 4.9002709E+12 : f32
      %106 = vector.broadcast %cst_49 : f32 to vector<8x128xf32>
      %107 = arith.mulf %106, %84 : vector<8x128xf32>
      %108 = arith.mulf %107, %102 : vector<8x128xf32>
      %109 = arith.addf %105, %108 : vector<8x128xf32>
      %cst_50 = arith.constant 3.98589205E+14 : f32
      %110 = vector.broadcast %cst_50 : f32 to vector<8x128xf32>
      %111 = arith.mulf %110, %45 : vector<8x128xf32>
      %112 = arith.mulf %111, %100 : vector<8x128xf32>
      %cst_51 = arith.constant 4.9002709E+12 : f32
      %113 = vector.broadcast %cst_51 : f32 to vector<8x128xf32>
      %114 = arith.mulf %113, %85 : vector<8x128xf32>
      %115 = arith.mulf %114, %102 : vector<8x128xf32>
      %116 = arith.addf %112, %115 : vector<8x128xf32>
      %cst_52 = arith.constant 3.98589205E+14 : f32
      %117 = vector.broadcast %cst_52 : f32 to vector<8x128xf32>
      %118 = arith.mulf %117, %49 : vector<8x128xf32>
      %119 = arith.mulf %118, %100 : vector<8x128xf32>
      %cst_53 = arith.constant 4.9002709E+12 : f32
      %120 = vector.broadcast %cst_53 : f32 to vector<8x128xf32>
      %121 = arith.mulf %120, %86 : vector<8x128xf32>
      %122 = arith.mulf %121, %102 : vector<8x128xf32>
      %123 = arith.addf %119, %122 : vector<8x128xf32>
      %124 = vector.broadcast %5 : f32 to vector<8x128xf32>
      %125 = arith.mulf %53, %124 : vector<8x128xf32>
      %126 = arith.addf %41, %125 : vector<8x128xf32>
      %127 = vector.broadcast %7 : f32 to vector<8x128xf32>
      %128 = arith.mulf %109, %127 : vector<8x128xf32>
      %129 = arith.addf %126, %128 : vector<8x128xf32>
      %130 = vector.broadcast %5 : f32 to vector<8x128xf32>
      %131 = arith.mulf %57, %130 : vector<8x128xf32>
      %132 = arith.addf %45, %131 : vector<8x128xf32>
      %133 = vector.broadcast %7 : f32 to vector<8x128xf32>
      %134 = arith.mulf %116, %133 : vector<8x128xf32>
      %135 = arith.addf %132, %134 : vector<8x128xf32>
      %136 = vector.broadcast %5 : f32 to vector<8x128xf32>
      %137 = arith.mulf %61, %136 : vector<8x128xf32>
      %138 = arith.addf %49, %137 : vector<8x128xf32>
      %139 = vector.broadcast %7 : f32 to vector<8x128xf32>
      %140 = arith.mulf %123, %139 : vector<8x128xf32>
      %141 = arith.addf %138, %140 : vector<8x128xf32>
      %cst_54 = arith.constant 1.000000e+05 : f32
      %142 = vector.broadcast %cst_54 : f32 to vector<8x128xf32>
      %143 = arith.mulf %27, %142 : vector<8x128xf32>
      %144 = arith.subf %143, %129 : vector<8x128xf32>
      %cst_55 = arith.constant 1.000000e+05 : f32
      %145 = vector.broadcast %cst_55 : f32 to vector<8x128xf32>
      %146 = arith.mulf %29, %145 : vector<8x128xf32>
      %147 = arith.subf %146, %135 : vector<8x128xf32>
      %cst_56 = arith.constant 1.000000e+05 : f32
      %148 = vector.broadcast %cst_56 : f32 to vector<8x128xf32>
      %149 = arith.mulf %31, %148 : vector<8x128xf32>
      %150 = arith.subf %149, %141 : vector<8x128xf32>
      %151 = arith.mulf %144, %144 : vector<8x128xf32>
      %152 = arith.mulf %147, %147 : vector<8x128xf32>
      %153 = arith.addf %151, %152 : vector<8x128xf32>
      %154 = arith.mulf %150, %150 : vector<8x128xf32>
      %155 = arith.addf %153, %154 : vector<8x128xf32>
      %cst_57 = arith.constant 1.000000e+00 : f32
      %156 = vector.broadcast %cst_57 : f32 to vector<8x128xf32>
      %cst_58 = arith.constant 0.000000e+00 : f32
      %157 = vector.broadcast %cst_58 : f32 to vector<8x128xf32>
      %158 = arith.cmpf oeq, %75, %157 : vector<8x128xf32>
      %cst_59 = arith.constant 2.000000e+00 : f32
      %159 = vector.broadcast %cst_59 : f32 to vector<8x128xf32>
      %160 = arith.select %158, %159, %156 : vector<8x128xi1>, vector<8x128xf32>
      %cst_60 = arith.constant 2.000000e+00 : f32
      %161 = vector.broadcast %cst_60 : f32 to vector<8x128xf32>
      %162 = arith.cmpf oeq, %75, %161 : vector<8x128xf32>
      %cst_61 = arith.constant 1.500000e+00 : f32
      %163 = vector.broadcast %cst_61 : f32 to vector<8x128xf32>
      %164 = arith.select %162, %163, %160 : vector<8x128xi1>, vector<8x128xf32>
      %cst_62 = arith.constant 1.000000e+00 : f32
      %165 = vector.broadcast %cst_62 : f32 to vector<8x128xf32>
      %166 = arith.cmpf oeq, %75, %165 : vector<8x128xf32>
      %cst_63 = arith.constant 5.000000e-01 : f32
      %167 = vector.broadcast %cst_63 : f32 to vector<8x128xf32>
      %168 = arith.select %166, %167, %164 : vector<8x128xi1>, vector<8x128xf32>
      %cst_64 = arith.constant 0.000000e+00 : f32
      %169 = vector.broadcast %cst_64 : f32 to vector<8x128xf32>
      %170 = arith.select %25, %83, %169 : vector<8x128xi1>, vector<8x128xf32>
      %cst_65 = arith.constant 0.000000e+00 : f32
      %171 = vector.broadcast %cst_65 : f32 to vector<8x128xf32>
      %172 = arith.select %25, %155, %171 : vector<8x128xi1>, vector<8x128xf32>
      %cst_66 = arith.constant 0.000000e+00 : f32
      %173 = vector.broadcast %cst_66 : f32 to vector<8x128xf32>
      %174 = arith.select %25, %168, %173 : vector<8x128xi1>, vector<8x128xf32>
      %cst_67 = arith.constant dense<0.000000e+00> : vector<8xf32>
      %175 = vector.multi_reduction <add>, %170, %cst_67 [1] : vector<8x128xf32> to vector<8xf32>
      %176 = vector.shape_cast %175 : vector<8xf32> to vector<8x1xf32>
      %cst_68 = arith.constant dense<0.000000e+00> : vector<1xf32>
      %177 = vector.multi_reduction <add>, %176, %cst_68 [0] : vector<8x1xf32> to vector<1xf32>
      %178 = vector.shape_cast %177 : vector<1xf32> to vector<1x1xf32>
      %cst_69 = arith.constant dense<0.000000e+00> : vector<8xf32>
      %179 = vector.multi_reduction <add>, %172, %cst_69 [1] : vector<8x128xf32> to vector<8xf32>
      %180 = vector.shape_cast %179 : vector<8xf32> to vector<8x1xf32>
      %cst_70 = arith.constant dense<0.000000e+00> : vector<1xf32>
      %181 = vector.multi_reduction <add>, %180, %cst_70 [0] : vector<8x1xf32> to vector<1xf32>
      %182 = vector.shape_cast %181 : vector<1xf32> to vector<1x1xf32>
      %cst_71 = arith.constant dense<0.000000e+00> : vector<8xf32>
      %183 = vector.multi_reduction <add>, %174, %cst_71 [1] : vector<8x128xf32> to vector<8xf32>
      %184 = vector.shape_cast %183 : vector<8xf32> to vector<8x1xf32>
      %cst_72 = arith.constant dense<0.000000e+00> : vector<1xf32>
      %185 = vector.multi_reduction <add>, %184, %cst_72 [0] : vector<8x1xf32> to vector<1xf32>
      %186 = vector.shape_cast %185 : vector<1xf32> to vector<1x1xf32>
      %187 = tpu.iota {dimensions = array<i32: 0>} : vector<8x128xi32>
      %c0_i32_73 = arith.constant 0 : i32
      %188 = vector.broadcast %c0_i32_73 : i32 to vector<8x128xi32>
      %189 = arith.cmpi eq, %187, %188 : vector<8x128xi32>
      %cst_74 = arith.constant 0.000000e+00 : f32
      %190 = vector.shape_cast %178 : vector<1x1xf32> to vector<1x1xf32>
      %191 = vector.broadcast %190 : vector<1x1xf32> to vector<8x128xf32>
      %192 = vector.broadcast %cst_74 : f32 to vector<8x128xf32>
      %193 = arith.select %189, %191, %192 : vector<8x128xi1>, vector<8x128xf32>
      %c1_i32_75 = arith.constant 1 : i32
      %194 = vector.broadcast %c1_i32_75 : i32 to vector<8x128xi32>
      %195 = arith.cmpi eq, %187, %194 : vector<8x128xi32>
      %cst_76 = arith.constant 0.000000e+00 : f32
      %196 = vector.shape_cast %182 : vector<1x1xf32> to vector<1x1xf32>
      %197 = vector.broadcast %196 : vector<1x1xf32> to vector<8x128xf32>
      %198 = vector.broadcast %cst_76 : f32 to vector<8x128xf32>
      %199 = arith.select %195, %197, %198 : vector<8x128xi1>, vector<8x128xf32>
      %200 = arith.addf %193, %199 : vector<8x128xf32>
      %c2_i32 = arith.constant 2 : i32
      %201 = vector.broadcast %c2_i32 : i32 to vector<8x128xi32>
      %202 = arith.cmpi eq, %187, %201 : vector<8x128xi32>
      %cst_77 = arith.constant 0.000000e+00 : f32
      %203 = vector.shape_cast %186 : vector<1x1xf32> to vector<1x1xf32>
      %204 = vector.broadcast %203 : vector<1x1xf32> to vector<8x128xf32>
      %205 = vector.broadcast %cst_77 : f32 to vector<8x128xf32>
      %206 = arith.select %202, %204, %205 : vector<8x128xi1>, vector<8x128xf32>
      %207 = arith.addf %200, %206 : vector<8x128xf32>
      %c0_78 = arith.constant 0 : index
      %c0_79 = arith.constant 0 : index
      %208 = vector.load %arg4[%c0_78, %c0_79] : memref<8x128xf32, #tpu.memory_space<vmem>>, vector<8x128xf32>
      %209 = arith.addf %208, %207 : vector<8x128xf32>
      %c0_80 = arith.constant 0 : index
      %c0_81 = arith.constant 0 : index
      %210 = vector.load %arg4[%c0_80, %c0_81] : memref<8x128xf32, #tpu.memory_space<vmem>>, vector<8x128xf32>
      tpu.vector_store %arg4[%c0_80, %c0_81], %209 {strides = array<i32>} : memref<8x128xf32, #tpu.memory_space<vmem>>, vector<8x128xf32>,
    } else {
    }
    return
  }
  func.func @transform_0(%arg0: i32, %arg1: i32) -> i32 {
    %c0_i32 = arith.constant 0 : i32
    %c0_i32_0 = arith.constant 0 : i32
    return %c0_i32 : i32
  }
  func.func @transform_1(%arg0: i32, %arg1: i32) -> (i32, i32, i32) {
    %c1_i32 = arith.constant 1 : i32
    %0 = arith.muli %arg0, %c1_i32 : i32
    %1 = arith.addi %0, %arg1 : i32
    %c0_i32 = arith.constant 0 : i32
    %c0_i32_0 = arith.constant 0 : i32
    %c0_i32_1 = arith.constant 0 : i32
    return %c0_i32, %c0_i32_0, %1 : i32, i32, i32
  }
  func.func @transform_2(%arg0: i32, %arg1: i32) -> (i32, i32) {
    %c0_i32 = arith.constant 0 : i32
    %c0_i32_0 = arith.constant 0 : i32
    return %arg0, %c0_i32 : i32, i32
  }
}

</mosaic_0001>

<bundles_post_ra>
// kernel: tpu_custom_call.1
= control target key start
LH: loop header
LB: loop body
LE: loop exit
PB: predicated region body
PF: predicated region fallthrough
CT: control target
= control target key end

     0   :  { %8 = vsyncpa [#allocation4], 0  ;;  %s522_s0 = inlined_call_operand.<no memory space> [shape: f32[1], index: 0, kind: input, shape index: {}]   ;;  %s523_s1 = inlined_call_operand.hbm [shape: f32[16,8,128], index: 1, kind: input, shape index: {}]   ;;  %s524_s2 = inlined_call_operand.hbm [shape: f32[8,128], index: 2, kind: output, shape index: {}]  }
   0x1   :  { %9 = vsyncpa [#allocation5], 0  ;;  %s434_s9 = smov [#allocation3]   ;;  %s386_s13 = scalar_lea.hbm %s523_s1, 2048 }
   0x2   :  { %s20_s10 = sshll.u32 %s434_s9, 4  ;;  %p387_p0 = scmp.ne.s32.totalorder %s523_s1, %s386_s13  ;;  %s21_s10 = int_to_ptr.vmem [resolvable:$true] %s20_s10 }
   0x3   :  { %p390_p1 = scmp.lt.u32.totalorder %s386_s13, %s523_s1 }
   0x5   :  { %p392_p2 = pnand %p390_p1, %p387_p0 }
   0x7   :  { %395 = shalt.err (!%p392_p2)
}
   0x8   :  { %s396_s18 = scalar_lea.vmem %s21_s10, 2048  ;;  %p401_p4 = scmp.lt.s32.totalorder %s21_s10, %s21_s10 }
   0x9   :  { %p397_p3 = scmp.ne.s32.totalorder %s21_s10, %s396_s18  ;;  %p402_p5 = scmp.lt.s32.totalorder %s396_s18, %s396_s18 }
   0xb   :  { %p403_p6 = por %p402_p5, %p401_p4 }
   0xd   :  { %p404_p7 = pnand %p403_p6, %p397_p3 }
   0xf   :  { %407 = shalt.err (!%p404_p7)
}
  0x10   :  { %s435_s19 = smov 128   ;;  %s436_s20 = smov 8  }
  0x11   :  { %26 = dma.hbm_to_vmem [thread:$0]  %s523_s1, 2048, %s21_s10, [#allocation4], %s435_s19, %s435_s19, %s436_s20  }
  0x12   :  { %430 = dma.done.wait [#allocation4], 2048  }
  0x13   :  { %431 = vsyncadd [#allocation4], 4294965248  ;;  %v200_v0 = vlaneseq  ;;  %v469_v4 = vld [vmem:[#allocation3] sm:$0xff]  ;;  %v471_v5 = vld [vmem:[#allocation3 + $0x8] sm:$0xff]  ;;  %v437_v21 = vmov 1.0   ;;  %s38_s24 = smul.f32 0.5, %s522_s0  ;;  %v292_v62 = vstv %s522_s0 }
  0x14   :  { %v473_v6 = vld [vmem:[#allocation3 + $0x10] sm:$0xff]  ;;  %v216_v7 = vld [vmem:[#allocation3 + $0x18] sm:$0xff]  ;;  %v218_v8 = vld [vmem:[#allocation3 + $0x20] sm:$0xff] }
  0x15   :  { %v466_v1 = vshrl.u32 %v200_v0, 7  ;;  %v203_v2 = vand.u32 127, %v200_v0  ;;  %v220_v9 = vld [vmem:[#allocation3 + $0x28] sm:$0xff]  ;;  %v250_v11 = vsub.f32 %v469_v4, %v216_v7  ;;  %v251_v12 = vsub.f32 %v471_v5, %v218_v8  ;;  %v249_v14 = vld [vmem:[#allocation3 + $0x78] sm:$0xff]  ;;  %v222_v15 = vld [vmem:[#allocation3 + $0x30] sm:$0xff]  ;;  %s39_s29 = smul.f32 %s38_s24, %s522_s0  ;;  %s438_s0 = smov [#allocation6]  }
  0x16   :  { %v252_v13 = vsub.f32 %v473_v6, %v220_v9  ;;  %v225_v16 = vld [vmem:[#allocation3 + $0x38] sm:$0xff]  ;;  %vm317_vm0 = vcmp.eq.f32.partialorder %v249_v14, 0.0  ;;  %vm319_vm1 = vcmp.eq.f32.partialorder %v249_v14, 2.0  ;;  %vm321_vm2 = vcmp.eq.f32.partialorder %v249_v14, 1.0  ;;  %v228_v17 = vld [vmem:[#allocation3 + $0x40] sm:$0xff]  ;;  %v243_v28 = vld [vmem:[#allocation3 + $0x68] sm:$0xff] }
  0x17   :  { %v205_v3 = vmul.u32 128, %v466_v1  ;;  %v253_v18 = vmul.f32 %v250_v11, %v250_v11  ;;  %v254_v19 = vmul.f32 %v251_v12, %v251_v12  ;;  %v318_v22 = vsel %vm317_vm0, 2.0, %v437_v21  ;;  %v240_v23 = vld [vmem:[#allocation3 + $0x60] sm:$0xff]  ;;  %v246_v29 = vld [vmem:[#allocation3 + $0x70] sm:$0xff]  ;;  %v231_v51 = vld [vmem:[#allocation3 + $0x48] sm:$0xff]  ;;  %s367_s30 = sshll.u32 %s438_s0, 4  ;;  %s368_s30 = int_to_ptr.vmem [resolvable:$true] %s367_s30 }
  0x18   :  { %v256_v20 = vmul.f32 %v252_v13, %v252_v13  ;;  %v320_v24 = vsel %vm319_vm1, 1.5, %v318_v22  ;;  %v223_v25 = vmul.f32 100000.0, %v222_v15  ;;  %v226_v26 = vmul.f32 100000.0, %v225_v16  ;;  %v234_v52 = vld [vmem:[#allocation3 + $0x50] sm:$0xff]  ;;  %v237_v53 = vld [vmem:[#allocation3 + $0x58] sm:$0xff]  ;;  %s408_s3 = scalar_lea.vmem %s368_s30, 128  ;;  %p413_p9 = scmp.lt.s32.totalorder %s368_s30, %s368_s30 }
  0x19   :  { %v475_v10 = vadd.s32 %v205_v3, %v203_v2  ;;  %v480_v27 = vmul.f32 100000.0, %v228_v17  ;;  %v255_v30 = vadd.f32 %v254_v19, %v253_v18  ;;  %v322_v31 = vsel %vm321_vm2, 0.5, %v320_v24  ;;  %p409_p8 = scmp.ne.s32.totalorder %s368_s30, %s408_s3  ;;  %p414_p10 = scmp.lt.s32.totalorder %s408_s3, %s408_s3 }
  0x1a   :  { %v241_v33 = vmul.f32 100000.0, %v240_v23  ;;  %v244_v34 = vmul.f32 100000.0, %v243_v28  ;;  %v247_v35 = vmul.f32 100000.0, %v246_v29  ;;  %v261_v37 = vmul.f32 %v223_v25, %v223_v25 }
  0x1b   :  { %vm209_vm3 = vcmp.lt.s32.totalorder %v475_v10, 8  ;;  %v257_v36 = vadd.f32 %v256_v20, %v255_v30  ;;  %v262_v38 = vmul.f32 %v226_v26, %v226_v26  ;;  %v264_v39 = vmul.f32 %v480_v27, %v480_v27  ;;  %p415_p11 = por %p414_p10, %p413_p9 }
  0x1c   :  { %v325_v32 = vsel %vm209_vm3, %v322_v31, 0.0  ;;  %v258_v40 = vsub.f32 %v223_v25, %v241_v33  ;;  %v259_v41 = vsub.f32 %v226_v26, %v244_v34  ;;  %v260_v42 = vsub.f32 %v480_v27, %v247_v35 }
  0x1d   :  { %342 = vadd.xlane.f32.xlu1 %v325_v32  ;;  %v323_v43 = vsel %vm209_vm3, %v257_v36, 0.0  ;;  %v263_v44 = vadd.f32 %v262_v38, %v261_v37  ;;  %v232_v55 = vmul.f32 1000.0, %v231_v51  ;;  %v235_v56 = vmul.f32 1000.0, %v234_v52  ;;  %p416_p12 = pnand %p415_p11, %p409_p8 }
  0x1e   :  { %326 = vadd.xlane.f32.xlu0 %v323_v43  ;;  %v267_v45 = vmul.f32 %v258_v40, %v258_v40  ;;  %v268_v46 = vmul.f32 %v259_v41, %v259_v41  ;;  %v270_v47 = vmul.f32 %v260_v42, %v260_v42  ;;  %v238_v57 = vmul.f32 1000.0, %v237_v53 }
  0x1f   :  { %v265_v48 = vadd.f32 %v264_v39, %v263_v44  ;;  %v277_v59 = vmul.f32 3.985892e+14, %v223_v25  ;;  %v282_v60 = vmul.f32 3.985892e+14, %v226_v26  ;;  %v287_v61 = vmul.f32 3.985892e+14, %v480_v27 }
  0x20   :  { %v269_v49 = vadd.f32 %v268_v46, %v267_v45  ;;  %v279_v3 = vmul.f32 4.900271e+12, %v258_v40  ;;  %v284_v7 = vmul.f32 4.900271e+12, %v259_v41  ;;  %v289_v8 = vmul.f32 4.900271e+12, %v260_v42 }
  0x21   :  { %382 = vrsqrt.f32 %v265_v48  ;;  %v293_v9 = vmul.f32 %v292_v62, %v232_v55  ;;  %v298_v11 = vmul.f32 %v292_v62, %v235_v56  ;;  %v302_v12 = vmul.f32 %v292_v62, %v238_v57 }
  0x22   :  { %v271_v50 = vadd.f32 %v270_v47, %v269_v49  ;;  %v295_v21 = vstv %s39_s29  ;;  %v306_v30 = vmul.f32 100000.0, %v469_v4  ;;  %v308_v31 = vmul.f32 100000.0, %v471_v5 }
  0x23   :  { %v294_v20 = vadd.f32 %v293_v9, %v223_v25  ;;  %v299_v22 = vadd.f32 %v298_v11, %v226_v26  ;;  %v303_v29 = vadd.f32 %v302_v12, %v480_v27  ;;  %v310_v32 = vmul.f32 100000.0, %v473_v6 }
  0x24   :  { %384 = vrsqrt.f32 %v271_v50  ;;  %vm350_vm4 = vcmp.eq.s32.totalorder %v466_v1, 0  ;;  %vm352_vm5 = vcmp.eq.s32.totalorder %v466_v1, 1  ;;  %vm355_vm6 = vcmp.eq.s32.totalorder %v466_v1, 2 }
  0x2b   :  { %v383_v54 = vpop.eup %382 }
  0x2c   :  { %v273_v58 = vmul.f32 %v383_v54, %v383_v54 }
  0x2e   :  { %v385_v63 = vpop.eup %384  ;;  %v274_v0 = vmul.f32 %v383_v54, %v273_v58 }
  0x2f   :  { %v275_v2 = vmul.f32 %v385_v63, %v385_v63 }
  0x30   :  { %v278_v14 = vmul.f32 %v277_v59, %v274_v0  ;;  %v283_v15 = vmul.f32 %v282_v60, %v274_v0  ;;  %v288_v16 = vmul.f32 %v287_v61, %v274_v0 }
  0x31   :  { %v276_v13 = vmul.f32 %v385_v63, %v275_v2 }
  0x33   :  { %v280_v17 = vmul.f32 %v279_v3, %v276_v13  ;;  %v285_v18 = vmul.f32 %v284_v7, %v276_v13  ;;  %v290_v19 = vmul.f32 %v289_v8, %v276_v13 }
  0x35   :  { %v281_v23 = vadd.f32 %v280_v17, %v278_v14  ;;  %v286_v24 = vadd.f32 %v285_v18, %v283_v15  ;;  %v291_v28 = vadd.f32 %v290_v19, %v288_v16 }
  0x37   :  { %v296_v33 = vmul.f32 %v295_v21, %v281_v23  ;;  %v300_v34 = vmul.f32 %v295_v21, %v286_v24  ;;  %v304_v35 = vmul.f32 %v295_v21, %v291_v28 }
  0x39   :  { %v297_v36 = vadd.f32 %v296_v33, %v294_v20  ;;  %v301_v37 = vadd.f32 %v300_v34, %v299_v22  ;;  %v305_v38 = vadd.f32 %v304_v35, %v303_v29 }
  0x3b   :  { %v307_v25 = vsub.f32 %v306_v30, %v297_v36  ;;  %v309_v39 = vsub.f32 %v308_v31, %v301_v37  ;;  %v311_v26 = vsub.f32 %v310_v32, %v305_v38 }
  0x3d   :  { %v312_v40 = vmul.f32 %v307_v25, %v307_v25  ;;  %v313_v41 = vmul.f32 %v309_v39, %v309_v39  ;;  %v315_v42 = vmul.f32 %v311_v26, %v311_v26 }
  0x3f   :  { %v314_v43 = vadd.f32 %v313_v41, %v312_v40 }
  0x41   :  { %v316_v27 = vadd.f32 %v315_v42, %v314_v43 }
  0x43   :  { %v324_v4 = vsel %vm209_vm3, %v316_v27, 0.0 }
  0x44   :  { %334 = vadd.xlane.f32.xlu0 %v324_v4 }
  0xaa   :  { %v343_v6 = vpop.xlane.xlu1 %342 }
  0xab   :  { %v327_v5 = vpop.xlane.xlu0 %326  ;;  %v344_v45 = vrot.slane %v343_v6, 4 }
  0xac   :  { %v328_v44 = vrot.slane %v327_v5, 4 }
  0xad   :  { %v345_v47 = vadd.f32 %v344_v45, %v343_v6 }
  0xae   :  { %v329_v46 = vadd.f32 %v328_v44, %v327_v5 }
  0xaf   :  { %v346_v49 = vrot.slane %v345_v47, 2 }
  0xb0   :  { %v330_v48 = vrot.slane %v329_v46, 2 }
  0xb1   :  { %v347_v53 = vadd.f32 %v346_v49, %v345_v47 }
  0xb2   :  { %v331_v51 = vadd.f32 %v330_v48, %v329_v46 }
  0xb3   :  { %v348_v57 = vrot.slane %v347_v53, 1 }
  0xb4   :  { %v332_v55 = vrot.slane %v331_v51, 1 }
  0xb5   :  { %v349_v60 = vadd.f32 %v348_v57, %v347_v53 }
  0xb6   :  { %v333_v10 = vadd.f32 %v332_v55, %v331_v51 }
  0xb7   :  { %v356_v2 = vsel %vm355_vm6, %v349_v60, 0.0 }
  0xb8   :  { %v351_v62 = vsel %vm350_vm4, %v333_v10, 0.0 }
  0xd1   :  { %v335_v50 = vpop.xlane.xlu0 %334 }
  0xd2   :  { %v336_v52 = vrot.slane %v335_v50, 4 }
  0xd4   :  { %v337_v54 = vadd.f32 %v336_v52, %v335_v50 }
  0xd6   :  { %v338_v56 = vrot.slane %v337_v54, 2 }
  0xd8   :  { %v339_v58 = vadd.f32 %v338_v56, %v337_v54 }
  0xda   :  { %v340_v59 = vrot.slane %v339_v58, 1 }
  0xdc   :  { %v341_v61 = vadd.f32 %v340_v59, %v339_v58 }
  0xde   :  { %v353_v63 = vsel %vm352_vm5, %v341_v61, 0.0 }
  0xdf   :  { %v354_v0 = vadd.f32 %v353_v63, %v351_v62 }
  0xe1   :  { %v357_v3 = vadd.f32 %v356_v2, %v354_v0 }
  0xe3   :  { %360 = vst [vmem:[#allocation6] sm:$0xff] %v357_v3 }
  0xe4   :  { %419 = shalt.err (!%p416_p12)
}
  0xe5   :  { %s420_s6 = scalar_lea.hbm %s524_s2, 128 }
  0xe6   :  { %p421_p13 = scmp.ne.s32.totalorder %s524_s2, %s420_s6  ;;  %p424_p0 = scmp.lt.u32.totalorder %s420_s6, %s524_s2 }
  0xe8   :  { %p426_p1 = pnand %p424_p0, %p421_p13 }
  0xea   :  { %429 = shalt.err (!%p426_p1)
}
  0xeb   :  { %370 = dma.vmem_to_hbm [thread:$0]  %s368_s30, 128, %s524_s2, [#allocation5]  }
  0xec   :  { %432 = dma.done.wait [#allocation5], 128  }
  0xed   :  { %433 = vsyncadd [#allocation5], 4294967168 }
  0xee   :  { %374 = vsyncpa [#allocation4], 1 }
  0xef   :  { %375 = vsyncpa [#allocation5], 1 }

</bundles_post_ra>
